<compile_context>
chip_gen: v7x
topology: tpu7x:2x2x1
jax: 0.10.0
libtpu: 0.0.40
codegen_flags: <defaults>
</compile_context>

<pallas_src>
import numpy as np
import jax
import jax.numpy as jnp
from jax.experimental import pallas as pl
from jax.experimental.pallas import tpu as pltpu

_LANE = 128
_INV_SQRT_2PI = float(1.0 / np.sqrt(2.0 * np.pi))


def _make_nll_kernel(tm_eff, m_rows, need_mask):
    """Build the per-block kernel with static tile / row counts baked in."""

    def kernel(h_ref, img_ref, f1_ref, out_ref):
        h = h_ref[...].astype(jnp.float32)
        x = img_ref[...].astype(jnp.float32)
        f1 = f1_ref[...].astype(jnp.float32)

        # exp(Normal(0,1).log_prob(x)) == standard normal pdf
        pdf = jnp.exp(-0.5 * x * x) * _INV_SQRT_2PI
        likelihood = (1.0 - h) * pdf + h * jnp.exp(f1)

        if need_mask:
            # Rows beyond the true extent (ragged last block) contain garbage:
            # force likelihood to 1 there *before* the log so they add exactly 0.
            row = jax.lax.broadcasted_iota(jnp.int32, (tm_eff, _LANE), 0)
            gidx = row + pl.program_id(0) * tm_eff
            likelihood = jnp.where(gidx < m_rows, likelihood, 1.0)

        contrib = jnp.log(likelihood)

        if tm_eff % 8 == 0:
            # (tm,128) -> (tm//8, 8, 128) keeps the (8,128) minor tiles in place;
            # summing over the leading dim is pure VPU vreg adds.
            partial = jnp.sum(contrib.reshape(tm_eff // 8, 8, _LANE), axis=0)
        else:
            # Only hit when the whole problem is a single block of < 8 rows.
            partial = contrib

        out_ref[...] = partial

    return kernel


def nll_loss(h, image, f_1, *, tm=1024):
    """Pallas implementation of NllLoss.forward. Returns a float32 scalar."""
    assert h.shape == image.shape == f_1.shape
    n = int(np.prod(h.shape))
    assert n > 0

    h_f = jnp.reshape(h, (-1,))
    x_f = jnp.reshape(image, (-1,))
    f_f = jnp.reshape(f_1, (-1,))

    rem = n % _LANE
    if rem != 0:
        # Fallback (rare for image tensors): minimal pad to lane width with
        # neutral values h=1, x=0, f1=0 -> likelihood = 1 -> log = 0 contribution.
        pad = _LANE - rem
        h_f = jnp.concatenate([h_f, jnp.ones((pad,), h_f.dtype)])
        x_f = jnp.concatenate([x_f, jnp.zeros((pad,), x_f.dtype)])
        f_f = jnp.concatenate([f_f, jnp.zeros((pad,), f_f.dtype)])
        n += pad

    m_rows = n // _LANE
    h2 = h_f.reshape(m_rows, _LANE)
    x2 = x_f.reshape(m_rows, _LANE)
    f2 = f_f.reshape(m_rows, _LANE)

    # Effective row tile: multiple of 8, clamped to the problem size.
    tm = max(8, (int(tm) // 8) * 8)
    if m_rows < 8:
        tm_eff = m_rows                       # single full-extent block
    else:
        tm_eff = min(tm, (m_rows // 8) * 8)   # multiple of 8

    grid_size = (m_rows + tm_eff - 1) // tm_eff
    need_mask = (m_rows % tm_eff) != 0
    out_rows = 8 if tm_eff % 8 == 0 else tm_eff

    kernel = _make_nll_kernel(tm_eff, m_rows, need_mask)
    in_spec = pl.BlockSpec((tm_eff, _LANE), lambda i: (i, 0))

    partials = pl.pallas_call(
        kernel,
        out_shape=jax.ShapeDtypeStruct((grid_size * out_rows, _LANE), jnp.float32),
        grid_spec=pltpu.PrefetchScalarGridSpec(
            num_scalar_prefetch=0,
            grid=(grid_size,),
            in_specs=[in_spec, in_spec, in_spec],
            out_specs=pl.BlockSpec((out_rows, _LANE), lambda i: (i, 0)),
        ),
        compiler_params=pltpu.CompilerParams(
            dimension_semantics=("parallel",),
        ),
    )(h2, x2, f2)

    # Single cross-lane/sublane reduction + negate, done exactly once (tiny).
    return -jnp.sum(partials)


def _nll_loss_ref(h, image, f_1):
    pdf = jnp.exp(-0.5 * image * image) * _INV_SQRT_2PI
    likelihood = (1.0 - h) * pdf + h * jnp.exp(f_1)
    return -jnp.sum(jnp.log(likelihood))


def _check(shape, key, **kwargs):
    k1, k2, k3 = jax.random.split(key, 3)
    h = jax.random.uniform(k1, shape, jnp.float32, minval=0.05, maxval=0.95)
    image = jax.random.normal(k2, shape, jnp.float32)
    f_1 = jax.random.uniform(k3, shape, jnp.float32, minval=-2.0, maxval=0.0)
    loss = jax.block_until_ready(nll_loss(h, image, f_1, **kwargs))
    ref = jax.block_until_ready(_nll_loss_ref(h, image, f_1))
    np.testing.assert_allclose(np.asarray(loss), np.asarray(ref), rtol=1e-4, atol=1e-3)


if __name__ == "__main__":
    key = jax.random.PRNGKey(0)
    k_main, k_ragged, k_small = jax.random.split(key, 3)

    # Main shape: NCHW tensors shared by h, image, f_1.
    _check((2, 4, 16, 16), k_main)
    # Multi-block path with a ragged last block (exercises in-kernel masking).
    _check((1, 3, 24, 128), k_ragged, tm=32)
    # Tiny shape with N not a multiple of 128 (exercises the lane-pad fallback).
    _check((2, 3, 5, 7), k_small)

    print("KERNEL_OK")
</pallas_src>

<mosaic_0001>
module attributes {stable_mosaic.version = 11 : i64} {
  func.func @kernel(%arg0: i32, %arg1: memref<16x128xf32, #tpu.memory_space<vmem>>, %arg2: memref<16x128xf32, #tpu.memory_space<vmem>>, %arg3: memref<16x128xf32, #tpu.memory_space<vmem>>, %arg4: memref<8x128xf32, #tpu.memory_space<vmem>>) attributes {dimension_semantics = [#tpu.dimension_semantics<parallel>], iteration_bounds = array<i64: 1>, scalar_prefetch = 0 : i64, scratch_operands = 0 : i64, tpu.core_type = #tpu.core_type<tc>, window_params = [{transform_indices = @transform_0, window_bounds = array<i64: 16, 128>}, {transform_indices = @transform_1, window_bounds = array<i64: 16, 128>}, {transform_indices = @transform_2, window_bounds = array<i64: 16, 128>}, {transform_indices = @transform_3, window_bounds = array<i64: 8, 128>}]} {
    %c0 = arith.constant 0 : index
    %c0_0 = arith.constant 0 : index
    %0 = vector.load %arg1[%c0, %c0_0] : memref<16x128xf32, #tpu.memory_space<vmem>>, vector<16x128xf32>
    %c0_1 = arith.constant 0 : index
    %c0_2 = arith.constant 0 : index
    %1 = vector.load %arg2[%c0_1, %c0_2] : memref<16x128xf32, #tpu.memory_space<vmem>>, vector<16x128xf32>
    %c0_3 = arith.constant 0 : index
    %c0_4 = arith.constant 0 : index
    %2 = vector.load %arg3[%c0_3, %c0_4] : memref<16x128xf32, #tpu.memory_space<vmem>>, vector<16x128xf32>
    %cst = arith.constant -5.000000e-01 : f32
    %3 = vector.broadcast %cst : f32 to vector<16x128xf32>
    %4 = arith.mulf %3, %1 : vector<16x128xf32>
    %5 = arith.mulf %4, %1 : vector<16x128xf32>
    %6 = math.exp %5 : vector<16x128xf32>
    %cst_5 = arith.constant 0.398942292 : f32
    %7 = vector.broadcast %cst_5 : f32 to vector<16x128xf32>
    %8 = arith.mulf %6, %7 : vector<16x128xf32>
    %cst_6 = arith.constant 1.000000e+00 : f32
    %9 = vector.broadcast %cst_6 : f32 to vector<16x128xf32>
    %10 = arith.subf %9, %0 : vector<16x128xf32>
    %11 = arith.mulf %10, %8 : vector<16x128xf32>
    %12 = math.exp %2 : vector<16x128xf32>
    %13 = arith.mulf %0, %12 : vector<16x128xf32>
    %14 = arith.addf %11, %13 : vector<16x128xf32>
    %15 = math.log %14 : vector<16x128xf32>
    %16 = vector.shape_cast %15 : vector<16x128xf32> to vector<2x8x128xf32>
    %cst_7 = arith.constant dense<0.000000e+00> : vector<8x128xf32>
    %17 = vector.multi_reduction <add>, %16, %cst_7 [0] : vector<2x8x128xf32> to vector<8x128xf32>
    %c0_8 = arith.constant 0 : index
    %c0_9 = arith.constant 0 : index
    %18 = vector.load %arg4[%c0_8, %c0_9] : memref<8x128xf32, #tpu.memory_space<vmem>>, vector<8x128xf32>
    tpu.vector_store %arg4[%c0_8, %c0_9], %17 {strides = array<i32>} : memref<8x128xf32, #tpu.memory_space<vmem>>, vector<8x128xf32>,
    return
  }
  func.func @transform_0(%arg0: i32) -> (i32, i32) {
    %c0_i32 = arith.constant 0 : i32
    %c0_i32_0 = arith.constant 0 : i32
    return %arg0, %c0_i32 : i32, i32
  }
  func.func @transform_1(%arg0: i32) -> (i32, i32) {
    %c0_i32 = arith.constant 0 : i32
    %c0_i32_0 = arith.constant 0 : i32
    return %arg0, %c0_i32 : i32, i32
  }
  func.func @transform_2(%arg0: i32) -> (i32, i32) {
    %c0_i32 = arith.constant 0 : i32
    %c0_i32_0 = arith.constant 0 : i32
    return %arg0, %c0_i32 : i32, i32
  }
  func.func @transform_3(%arg0: i32) -> (i32, i32) {
    %c0_i32 = arith.constant 0 : i32
    %c0_i32_0 = arith.constant 0 : i32
    return %arg0, %c0_i32 : i32, i32
  }
}

</mosaic_0001>

<bundles_post_ra>
// kernel: tpu_custom_call.1
= control target key start
LH: loop header
LB: loop body
LE: loop exit
PB: predicated region body
PF: predicated region fallthrough
CT: control target
= control target key end

     0   :  { %8 = vsyncpa [#allocation3], 0  ;;  %s308_s0 = inlined_call_operand.hbm [shape: f32[16,128], index: 0, kind: input, shape index: {}]   ;;  %s309_s1 = inlined_call_operand.hbm [shape: f32[16,128], index: 1, kind: input, shape index: {}]   ;;  %s310_s2 = inlined_call_operand.hbm [shape: f32[16,128], index: 2, kind: input, shape index: {}]   ;;  %s311_s3 = inlined_call_operand.hbm [shape: f32[8,128], index: 3, kind: output, shape index: {}]  }
   0x1   :  { %9 = vsyncpa [#allocation6], 0 }
   0x2   :  { %10 = vsyncpa [#allocation4], 0  ;;  %s218_s12 = smov [#allocation5]   ;;  %s219_s14 = smov [#allocation2]  }
   0x3   :  { %s28_s13 = sshll.u32 %s218_s12, 4  ;;  %s16_s15 = sshll.u32 %s219_s14, 4  ;;  %s29_s13 = int_to_ptr.vmem [resolvable:$true] %s28_s13  ;;  %s244_s15 = int_to_ptr.vmem [resolvable:$true] %s16_s15 }
   0x4   :  { %s124_s18 = scalar_lea.hbm %s309_s1, 256 }
   0x5   :  { %p125_p0 = scmp.ne.s32.totalorder %s309_s1, %s124_s18  ;;  %p128_p1 = scmp.lt.u32.totalorder %s124_s18, %s309_s1 }
   0x7   :  { %p130_p2 = pnand %p128_p1, %p125_p0 }
   0x9   :  { %133 = shalt.err (!%p130_p2)
}
   0xa   :  { %s134_s23 = scalar_lea.vmem %s29_s13, 256  ;;  %p139_p4 = scmp.lt.s32.totalorder %s29_s13, %s29_s13 }
   0xb   :  { %p135_p3 = scmp.ne.s32.totalorder %s29_s13, %s134_s23  ;;  %p140_p5 = scmp.lt.s32.totalorder %s134_s23, %s134_s23 }
   0xd   :  { %p141_p6 = por %p140_p5, %p139_p4 }
   0xf   :  { %p142_p7 = pnand %p141_p6, %p135_p3 }
  0x11   :  { %145 = shalt.err (!%p142_p7)
}
  0x12   :  { %s220_s24 = smov 128   ;;  %s221_s25 = smov 8  }
  0x13   :  { %34 = dma.hbm_to_vmem [thread:$0]  %s309_s1, 256, %s29_s13, [#allocation6], %s220_s24, %s220_s24, %s221_s25  }
  0x14   :  { %s146_s30 = scalar_lea.hbm %s308_s0, 256 }
  0x15   :  { %p147_p8 = scmp.ne.s32.totalorder %s308_s0, %s146_s30  ;;  %p150_p9 = scmp.lt.u32.totalorder %s146_s30, %s308_s0 }
  0x17   :  { %p152_p10 = pnand %p150_p9, %p147_p8 }
  0x19   :  { %155 = shalt.err (!%p152_p10)
}
  0x1a   :  { %s156_s8 = scalar_lea.vmem %s244_s15, 256  ;;  %p161_p12 = scmp.lt.s32.totalorder %s244_s15, %s244_s15 }
  0x1b   :  { %p157_p11 = scmp.ne.s32.totalorder %s244_s15, %s156_s8  ;;  %p162_p13 = scmp.lt.s32.totalorder %s156_s8, %s156_s8 }
  0x1d   :  { %p163_p0 = por %p162_p13, %p161_p12 }
  0x1f   :  { %p164_p1 = pnand %p163_p0, %p157_p11 }
  0x21   :  { %167 = shalt.err (!%p164_p1)
}
  0x22   :  { %22 = dma.hbm_to_vmem [thread:$0]  %s308_s0, 256, %s244_s15, [#allocation3], %s220_s24, %s220_s24, %s221_s25  }
  0x23   :  { %s222_s10 = smov [#allocation7]   ;;  %s168_s14 = scalar_lea.hbm %s310_s2, 256 }
  0x24   :  { %s40_s11 = sshll.u32 %s222_s10, 4  ;;  %p169_p2 = scmp.ne.s32.totalorder %s310_s2, %s168_s14  ;;  %s41_s11 = int_to_ptr.vmem [resolvable:$true] %s40_s11 }
  0x25   :  { %p172_p3 = scmp.lt.u32.totalorder %s168_s14, %s310_s2 }
  0x27   :  { %p174_p4 = pnand %p172_p3, %p169_p2 }
  0x29   :  { %177 = shalt.err (!%p174_p4)
}
  0x2a   :  { %s178_s20 = scalar_lea.vmem %s41_s11, 256  ;;  %p183_p6 = scmp.lt.s32.totalorder %s41_s11, %s41_s11 }
  0x2b   :  { %p179_p5 = scmp.ne.s32.totalorder %s41_s11, %s178_s20  ;;  %p184_p7 = scmp.lt.s32.totalorder %s178_s20, %s178_s20 }
  0x2d   :  { %p185_p8 = por %p184_p7, %p183_p6 }
  0x2f   :  { %p186_p9 = pnand %p185_p8, %p179_p5 }
  0x31   :  { %189 = shalt.err (!%p186_p9)
}
  0x32   :  { %46 = dma.hbm_to_vmem [thread:$0]  %s310_s2, 256, %s41_s11, [#allocation6], %s220_s24, %s220_s24, %s221_s25  }
  0x33   :  { %212 = dma.done.wait [#allocation3], 256  }
  0x34   :  { %213 = vsyncadd [#allocation3], 4294967040 }
  0x35   :  { %214 = dma.done.wait [#allocation6], 512  }
  0x36   :  { %215 = vsyncadd [#allocation6], 4294966784  ;;  %v58_v0 = vld [vmem:[#allocation5] sm:$0xff]  ;;  %v59_v1 = vld [vmem:[#allocation5 + $0x8] sm:$0xff]  ;;  %s223_s2 = smov [#allocation8]  }
  0x37   :  { %v60_v2 = vld [vmem:[#allocation7] sm:$0xff]  ;;  %v61_v3 = vld [vmem:[#allocation7 + $0x8] sm:$0xff]  ;;  %v62_v4 = vmul.f32 -0.5, %v58_v0  ;;  %v63_v5 = vmul.f32 -0.5, %v59_v1  ;;  %s96_s21 = sshll.u32 %s223_s2, 4  ;;  %s97_s21 = int_to_ptr.vmem [resolvable:$true] %s96_s21 }
  0x38   :  { %v76_v6 = vmul.f32 1.442695, %v60_v2  ;;  %v78_v7 = vmul.f32 1.442695, %v61_v3  ;;  %v56_v12 = vld [vmem:[#allocation2] sm:$0xff]  ;;  %v57_v13 = vld [vmem:[#allocation2 + $0x8] sm:$0xff]  ;;  %p195_p11 = scmp.lt.s32.totalorder %s97_s21, %s97_s21 }
  0x39   :  { %v64_v8 = vmul.f32 %v62_v4, %v58_v0  ;;  %v65_v9 = vmul.f32 %v63_v5, %v59_v1  ;;  %v72_v16 = vsub.f32 1.0, %v56_v12  ;;  %v73_v18 = vsub.f32 1.0, %v57_v13  ;;  %s190_s22 = scalar_lea.vmem %s97_s21, 128 }
  0x3a   :  { %112 = vpow2.f32 %v76_v6  ;;  %p191_p10 = scmp.ne.s32.totalorder %s97_s21, %s190_s22  ;;  %p196_p12 = scmp.lt.s32.totalorder %s190_s22, %s190_s22 }
  0x3b   :  { %v66_v10 = vmul.f32 1.442695, %v64_v8  ;;  %v68_v11 = vmul.f32 1.442695, %v65_v9  ;;  %114 = vpow2.f32 %v78_v7 }
  0x3c   :  { %p197_p13 = por %p196_p12, %p195_p11 }
  0x3d   :  { %116 = vpow2.f32 %v66_v10 }
  0x3e   :  { %118 = vpow2.f32 %v68_v11  ;;  %p198_p0 = pnand %p197_p13, %p191_p10 }
  0x44   :  { %v113_v14 = vpop.eup %112 }
  0x45   :  { %v115_v15 = vpop.eup %114  ;;  %v80_v21 = vmul.f32 %v113_v14, %v56_v12 }
  0x46   :  { %v81_v23 = vmul.f32 %v115_v15, %v57_v13 }
  0x47   :  { %v117_v17 = vpop.eup %116 }
  0x48   :  { %v119_v19 = vpop.eup %118  ;;  %v70_v20 = vmul.f32 0.3989423, %v117_v17 }
  0x49   :  { %v71_v22 = vmul.f32 0.3989423, %v119_v19 }
  0x4a   :  { %v74_v24 = vmul.f32 %v72_v16, %v70_v20 }
  0x4b   :  { %v75_v25 = vmul.f32 %v73_v18, %v71_v22 }
  0x4c   :  { %v82_v26 = vadd.f32 %v80_v21, %v74_v24 }
  0x4d   :  { %v83_v27 = vadd.f32 %v81_v23, %v75_v25 }
  0x4e   :  { %120 = vlog2.f32 %v82_v26 }
  0x4f   :  { %122 = vlog2.f32 %v83_v27 }
  0x58   :  { %v121_v28 = vpop.eup %120 }
  0x59   :  { %v123_v29 = vpop.eup %122  ;;  %v85_v30 = vmul.f32 0.6931472, %v121_v28 }
  0x5a   :  { %v87_v31 = vmul.f32 0.6931472, %v123_v29 }
  0x5c   :  { %v88_v32 = vadd.f32 %v87_v31, %v85_v30 }
  0x5e   :  { %89 = vst [vmem:[#allocation8] sm:$0xff] %v88_v32 }
  0x5f   :  { %201 = shalt.err (!%p198_p0)
}
  0x60   :  { %s202_s25 = scalar_lea.hbm %s311_s3, 128 }
  0x61   :  { %p203_p1 = scmp.ne.s32.totalorder %s311_s3, %s202_s25  ;;  %p206_p2 = scmp.lt.u32.totalorder %s202_s25, %s311_s3 }
  0x63   :  { %p208_p3 = pnand %p206_p2, %p203_p1 }
  0x65   :  { %211 = shalt.err (!%p208_p3)
}
  0x66   :  { %99 = dma.vmem_to_hbm [thread:$0]  %s97_s21, 128, %s311_s3, [#allocation4]  }
  0x67   :  { %216 = dma.done.wait [#allocation4], 128  }
  0x68   :  { %217 = vsyncadd [#allocation4], 4294967168 }
  0x69   :  { %103 = vsyncpa [#allocation3], 1 }
  0x6a   :  { %104 = vsyncpa [#allocation6], 1 }
  0x6b   :  { %105 = vsyncpa [#allocation4], 1 }

</bundles_post_ra>
